<compile_context>
chip_gen: v7x
topology: tpu7x:2x2x1
jax: 0.10.0
libtpu: 0.0.40
codegen_flags: <defaults>
</compile_context>

<pallas_src>
import functools

import jax
import jax.numpy as jnp
from jax import lax
from jax.experimental import pallas as pl
from jax.experimental.pallas import tpu as pltpu


# ----------------------------- shared math helpers -----------------------------

def _layer_norm(v, g, b, eps=1e-5):
    mu = jnp.mean(v, axis=-1, keepdims=True)
    d = v - mu
    var = jnp.mean(d * d, axis=-1, keepdims=True)
    return d * lax.rsqrt(var + eps) * g + b


def _gelu_tanh(v):
    # TODO(synk): PyTorch nn.GELU() default is the exact erf form; tanh
    # approximation used here (the in-script reference uses the same form).
    c = 0.7978845608028654  # sqrt(2/pi)
    return 0.5 * v * (1.0 + jnp.tanh(c * (v + 0.044715 * v * v * v)))


# ----------------------------- transformer block kernel -----------------------------

def _block_kernel(x_ref, ln1_g_ref, ln1_b_ref, wqkv_ref, wo_ref, bo_ref,
                  ln2_g_ref, ln2_b_ref, w1_ref, b1_ref, w2_ref, b2_ref,
                  o_ref, *, n_head, head_size):
    x = x_ref[...]                                   # (T, C), f32 residual stream
    T, C = x.shape
    hs = head_size
    cd = wqkv_ref.dtype                              # MXU compute dtype (bf16 / f32)

    # ---- pre-attention LayerNorm (f32) ----
    xn = _layer_norm(x, ln1_g_ref[...], ln1_b_ref[...])

    # ---- fused QKV projection: one lane-dense (C, 3C) MXU matmul ----
    # (1/sqrt(head_size) already folded into the Q weight columns at prep time.)
    qkv = jnp.dot(xn.astype(cd), wqkv_ref[...],
                  preferred_element_type=jnp.float32)             # (T, 3C) f32

    # ---- batched multi-head causal attention ----
    row = lax.broadcasted_iota(jnp.int32, (T, T), 0)
    col = lax.broadcasted_iota(jnp.int32, (T, T), 1)
    causal = (row >= col)[None, :, :]                             # (1, T, T)

    def split_heads(base):                                        # -> (H, T, hs)
        return jnp.stack(
            [lax.slice_in_dim(qkv, base + h * hs, base + (h + 1) * hs, axis=1)
             for h in range(n_head)], axis=0).astype(cd)

    q3 = split_heads(0)
    k3 = split_heads(C)
    v3 = split_heads(2 * C)

    # scores: one batched contraction over the head dim (no k.T materialization)
    s = jnp.einsum('hqd,hkd->hqk', q3, k3,
                   preferred_element_type=jnp.float32)            # (H, T, T)
    # diagonal is always unmasked -> no fully-masked rows -> no NaNs from -inf
    s = jnp.where(causal, s, -jnp.inf)

    m = jnp.max(s, axis=-1, keepdims=True)
    p = jnp.exp(s - m)                       # EUP-bound piece for hs <= 64
    denom = jnp.sum(p, axis=-1, keepdims=True)
    p = p * pl.reciprocal(denom, approx=True)                     # EUP vrcp slot

    o3 = jnp.einsum('hqk,hkd->hqd', p.astype(cd), v3,
                    preferred_element_type=jnp.float32)           # (H, T, hs)
    attn = jnp.concatenate([o3[h] for h in range(n_head)], axis=-1)   # (T, C)

    # ---- output projection + residual (lane-dense (T, C) slab) ----
    x = x + jnp.dot(attn.astype(cd), wo_ref[...],
                    preferred_element_type=jnp.float32) + bo_ref[...]

    # ---- FFN: LN2 -> Linear(4C) -> GELU -> Linear(C) -> residual ----
    xn2 = _layer_norm(x, ln2_g_ref[...], ln2_b_ref[...])
    h1 = jnp.dot(xn2.astype(cd), w1_ref[...],
                 preferred_element_type=jnp.float32) + b1_ref[...]
    h1 = _gelu_tanh(h1).astype(cd)           # keep (T, 4C) intermediate narrow
    ff = jnp.dot(h1, w2_ref[...], preferred_element_type=jnp.float32) + b2_ref[...]

    o_ref[...] = (x + ff).astype(o_ref.dtype)


def transformer_block(x, blk, *, n_head):
    B, T, C = x.shape
    hs = C // n_head
    H4 = 4 * C
    w_itemsize = jnp.dtype(blk["wqkv"].dtype).itemsize

    # Advisory cost estimate for XLA's scheduler around the custom call.
    flops = B * (2 * T * C * (3 * C)                 # fused QKV
                 + n_head * 2 * T * T * hs * 2       # QK^T + P@V
                 + 2 * T * C * C                     # output projection
                 + 2 * T * C * H4 + 2 * T * H4 * C)  # FFN
    transcendentals = B * (n_head * T * T + T * H4 + 2 * T)
    bytes_accessed = (2 * B * T * C * 4                                   # x in/out
                      + (C * 3 * C + C * C + C * H4 + H4 * C) * w_itemsize  # weights
                      + (6 * C + H4) * 4)                                 # LN/bias rows

    kernel = functools.partial(_block_kernel, n_head=n_head, head_size=hs)
    return pl.pallas_call(
        kernel,
        out_shape=jax.ShapeDtypeStruct((B, T, C), x.dtype),
        grid_spec=pltpu.PrefetchScalarGridSpec(
            num_scalar_prefetch=0,
            grid=(B,),
            in_specs=[
                pl.BlockSpec((None, T, C), lambda b: (b, 0, 0)),   # x (batch squeezed)
                pl.BlockSpec((1, C), lambda b: (0, 0)),            # ln1 gamma
                pl.BlockSpec((1, C), lambda b: (0, 0)),            # ln1 beta
                pl.BlockSpec((C, 3 * C), lambda b: (0, 0)),        # fused Wqkv
                pl.BlockSpec((C, C), lambda b: (0, 0)),            # Wo
                pl.BlockSpec((1, C), lambda b: (0, 0)),            # bo
                pl.BlockSpec((1, C), lambda b: (0, 0)),            # ln2 gamma
                pl.BlockSpec((1, C), lambda b: (0, 0)),            # ln2 beta
                pl.BlockSpec((C, H4), lambda b: (0, 0)),           # W1
                pl.BlockSpec((1, H4), lambda b: (0, 0)),           # b1
                pl.BlockSpec((H4, C), lambda b: (0, 0)),           # W2
                pl.BlockSpec((1, C), lambda b: (0, 0)),            # b2
            ],
            out_specs=pl.BlockSpec((None, T, C), lambda b: (b, 0, 0)),
        ),
        compiler_params=pltpu.CompilerParams(
            dimension_semantics=("parallel",),
            vmem_limit_bytes=48 * 1024 * 1024,   # above 16/32 MiB defaults, < v7x physical
        ),
        cost_estimate=pl.CostEstimate(flops=flops,
                                      transcendentals=transcendentals,
                                      bytes_accessed=bytes_accessed),
    )(x, blk["ln1_g"], blk["ln1_b"], blk["wqkv"], blk["wo"], blk["bo"],
      blk["ln2_g"], blk["ln2_b"], blk["w1"], blk["b1"], blk["w2"], blk["b2"])


# ----------------------------- final LN + reward head kernel -----------------------------

def _reward_kernel(x_ref, g_ref, b_ref, wr_ref, br_ref, o_ref):
    xn = _layer_norm(x_ref[...], g_ref[...], b_ref[...])            # (B, C)
    # N=1 matmul wastes an MXU pass and emits a 1-lane masked store; use a VPU
    # multiply + lane reduction instead (w_r is a (1, C) row).
    o_ref[...] = (jnp.sum(xn * wr_ref[...], axis=-1, keepdims=True)
                  + br_ref[...]).astype(o_ref.dtype)


def reward_head(x_last, lnf_g, lnf_b, w_r, b_r):
    B, C = x_last.shape
    vmem = pl.BlockSpec(memory_space=pltpu.MemorySpace.VMEM)
    return pl.pallas_call(
        _reward_kernel,
        out_shape=jax.ShapeDtypeStruct((B, 1), x_last.dtype),
        in_specs=[vmem] * 5,
        out_specs=vmem,
    )(x_last, lnf_g, lnf_b, w_r, b_r)


# ----------------------------- parameter preparation -----------------------------

def prepare_params(raw, *, n_head, compute_dtype=jnp.bfloat16):
    """One-time prep OUTSIDE the jitted forward: fuse Q/K/V into a (C, 3C) weight,
    fold 1/sqrt(head_size) into the Q columns, reshape LN params / biases to 2-D
    rows, and cast matmul weights to the MXU compute dtype (bf16 by default;
    LayerNorm params, biases and the residual stream stay f32)."""
    C = raw["wte"].shape[1]
    hs = C // n_head
    scale = jnp.float32(hs) ** -0.5
    row = lambda v: v.reshape(1, -1).astype(jnp.float32)

    blocks = []
    for blk in raw["blocks"]:
        wqkv = jnp.concatenate([blk["wq"] * scale, blk["wk"], blk["wv"]], axis=1)
        blocks.append(dict(
            ln1_g=row(blk["ln1_g"]), ln1_b=row(blk["ln1_b"]),
            wqkv=wqkv.astype(compute_dtype),
            wo=blk["wo"].astype(compute_dtype), bo=row(blk["bo"]),
            ln2_g=row(blk["ln2_g"]), ln2_b=row(blk["ln2_b"]),
            w1=blk["w1"].astype(compute_dtype), b1=row(blk["b1"]),
            w2=blk["w2"].astype(compute_dtype), b2=row(blk["b2"]),
        ))
    return dict(
        wte=raw["wte"].astype(jnp.float32),
        wpe=raw["wpe"].astype(jnp.float32),
        blocks=blocks,
        lnf_g=row(raw["lnf_g"]), lnf_b=row(raw["lnf_b"]),
        w_r=raw["w_r"].reshape(1, -1).astype(jnp.float32),   # (1, C) row for VPU reduce
        b_r=raw["b_r"].reshape(1, 1).astype(jnp.float32),
    )


# ----------------------------- full GPT_Reward forward -----------------------------

@functools.partial(jax.jit, static_argnames=("n_head",))
def gpt_reward_forward(params, tokens, *, n_head):
    # TODO(synk): token/position embedding gather stays in plain JAX (no clean
    # Pallas gather primitive for per-token indices at these sizes).
    B, T = tokens.shape
    x = jnp.take(params["wte"], tokens, axis=0) + params["wpe"][:T][None, :, :]
    for blk in params["blocks"]:
        x = transformer_block(x, blk, n_head=n_head)
    return reward_head(x[:, -1, :], params["lnf_g"], params["lnf_b"],
                       params["w_r"], params["b_r"])


# ----------------------------- parameters & reference -----------------------------

def init_params(key, *, n_vocab, embd_dim, window_size, n_head, n_layer):
    C = embd_dim
    keys = iter(jax.random.split(key, 64))
    nrm = lambda shape, std: jax.random.normal(next(keys), shape, jnp.float32) * std
    blocks = []
    for _ in range(n_layer):
        blocks.append(dict(
            ln1_g=1.0 + nrm((C,), 0.1), ln1_b=nrm((C,), 0.1),
            wq=nrm((C, C), 0.15), wk=nrm((C, C), 0.15), wv=nrm((C, C), 0.15),
            wo=nrm((C, C), 0.15), bo=nrm((C,), 0.05),
            ln2_g=1.0 + nrm((C,), 0.1), ln2_b=nrm((C,), 0.1),
            w1=nrm((C, 4 * C), 0.15), b1=nrm((4 * C,), 0.05),
            w2=nrm((4 * C, C), 0.15), b2=nrm((C,), 0.05),
        ))
    return dict(
        wte=nrm((n_vocab, C), 0.5),
        wpe=nrm((window_size, C), 0.5),
        blocks=blocks,
        lnf_g=1.0 + nrm((C,), 0.1), lnf_b=nrm((C,), 0.1),
        w_r=nrm((C, 1), 0.2), b_r=nrm((1,), 0.05),
    )


def _reference(params, tokens, n_head):
    """Plain-JAX forward mirroring the PyTorch GPT_Reward (eval mode, no mask)."""
    B, T = tokens.shape
    x = params["wte"][tokens] + params["wpe"][:T][None]
    C = x.shape[-1]
    hs = C // n_head

    def ln(v, g, b):
        mu = v.mean(-1, keepdims=True)
        var = ((v - mu) ** 2).mean(-1, keepdims=True)
        return (v - mu) / jnp.sqrt(var + 1e-5) * g + b

    tril = jnp.tril(jnp.ones((T, T), dtype=bool))
    for blk in params["blocks"]:
        xn = ln(x, blk["ln1_g"], blk["ln1_b"])
        heads = []
        for h in range(n_head):
            sl = slice(h * hs, (h + 1) * hs)
            q = xn @ blk["wq"][:, sl]
            k = xn @ blk["wk"][:, sl]
            v = xn @ blk["wv"][:, sl]
            w = (q @ jnp.swapaxes(k, -1, -2)) * hs ** -0.5
            w = jnp.where(tril, w, -jnp.inf)
            w = jax.nn.softmax(w, axis=-1)
            heads.append(w @ v)
        x = x + jnp.concatenate(heads, axis=-1) @ blk["wo"] + blk["bo"]
        xn2 = ln(x, blk["ln2_g"], blk["ln2_b"])
        x = x + _gelu_tanh(xn2 @ blk["w1"] + blk["b1"]) @ blk["w2"] + blk["b2"]
    xl = ln(x[:, -1, :], params["lnf_g"], params["lnf_b"])
    return xl @ params["w_r"] + params["b_r"]


if __name__ == "__main__":
    # Small config: vocab=64, embd_dim=32, window=8, 4 heads (head_size=8), 2 layers.
    n_vocab, embd_dim, window_size, n_head, n_layer = 64, 32, 8, 4, 2
    B, T = 2, 8

    key = jax.random.PRNGKey(0)
    kp, kt = jax.random.split(key)
    raw = init_params(kp, n_vocab=n_vocab, embd_dim=embd_dim,
                      window_size=window_size, n_head=n_head, n_layer=n_layer)
    tokens = jax.random.randint(kt, (B, T), 0, n_vocab, dtype=jnp.int32)

    with jax.default_matmul_precision("highest"):
        ref = _reference(raw, tokens, n_head)

    # f32 compute path: validates the kernel math against the reference
    # (tolerance accounts for the approx EUP reciprocal in the softmax).
    params_f32 = prepare_params(raw, n_head=n_head, compute_dtype=jnp.float32)
    out_f32 = jax.block_until_ready(gpt_reward_forward(params_f32, tokens, n_head=n_head))
    assert out_f32.shape == (B, 1)
    assert jnp.allclose(out_f32, ref, atol=5e-3, rtol=5e-3), (
        f"f32 mismatch vs reference: max abs err {jnp.max(jnp.abs(out_f32 - ref))}")

    # bf16 compute path (default; MXU-native on v5e/v6e/v7x): looser tolerance.
    params_bf16 = prepare_params(raw, n_head=n_head)
    out_bf16 = jax.block_until_ready(gpt_reward_forward(params_bf16, tokens, n_head=n_head))
    assert out_bf16.shape == (B, 1)
    assert jnp.all(jnp.isfinite(out_bf16))
    assert jnp.allclose(out_bf16, ref, atol=0.25, rtol=0.1), (
        f"bf16 mismatch vs reference: max abs err {jnp.max(jnp.abs(out_bf16 - ref))}")

    print("KERNEL_OK")
</pallas_src>

<mosaic_0001>
module attributes {stable_mosaic.version = 11 : i64} {
  func.func @_reward_kernel(%arg0: memref<2x32xf32, #tpu.memory_space<vmem>>, %arg1: memref<1x32xf32, #tpu.memory_space<vmem>>, %arg2: memref<1x32xf32, #tpu.memory_space<vmem>>, %arg3: memref<1x32xf32, #tpu.memory_space<vmem>>, %arg4: memref<1x1xf32, #tpu.memory_space<vmem>>, %arg5: memref<2x1xf32, #tpu.memory_space<vmem>>) attributes {dimension_semantics = [], scalar_prefetch = 0 : i64, scratch_operands = 0 : i64, tpu.core_type = #tpu.core_type<tc>} {
    %c0 = arith.constant 0 : index
    %c0_0 = arith.constant 0 : index
    %0 = vector.load %arg0[%c0, %c0_0] : memref<2x32xf32, #tpu.memory_space<vmem>>, vector<2x32xf32>
    %c0_1 = arith.constant 0 : index
    %c0_2 = arith.constant 0 : index
    %1 = vector.load %arg1[%c0_1, %c0_2] : memref<1x32xf32, #tpu.memory_space<vmem>>, vector<1x32xf32>
    %c0_3 = arith.constant 0 : index
    %c0_4 = arith.constant 0 : index
    %2 = vector.load %arg2[%c0_3, %c0_4] : memref<1x32xf32, #tpu.memory_space<vmem>>, vector<1x32xf32>
    %cst = arith.constant dense<0.000000e+00> : vector<2xf32>
    %3 = vector.multi_reduction <add>, %0, %cst [1] : vector<2x32xf32> to vector<2xf32>
    %4 = vector.shape_cast %3 : vector<2xf32> to vector<2x1xf32>
    %cst_5 = arith.constant 3.200000e+01 : f32
    %5 = vector.broadcast %cst_5 : f32 to vector<2x1xf32>
    %6 = arith.divf %4, %5 : vector<2x1xf32>
    %7 = vector.broadcast %6 : vector<2x1xf32> to vector<2x32xf32>
    %8 = arith.subf %0, %7 : vector<2x32xf32>
    %9 = arith.mulf %8, %8 : vector<2x32xf32>
    %cst_6 = arith.constant dense<0.000000e+00> : vector<2xf32>
    %10 = vector.multi_reduction <add>, %9, %cst_6 [1] : vector<2x32xf32> to vector<2xf32>
    %11 = vector.shape_cast %10 : vector<2xf32> to vector<2x1xf32>
    %cst_7 = arith.constant 3.200000e+01 : f32
    %12 = vector.broadcast %cst_7 : f32 to vector<2x1xf32>
    %13 = arith.divf %11, %12 : vector<2x1xf32>
    %cst_8 = arith.constant 9.99999974E-6 : f32
    %14 = vector.broadcast %cst_8 : f32 to vector<2x1xf32>
    %15 = arith.addf %13, %14 : vector<2x1xf32>
    %16 = math.rsqrt %15 : vector<2x1xf32>
    %17 = vector.broadcast %16 : vector<2x1xf32> to vector<2x32xf32>
    %18 = arith.mulf %8, %17 : vector<2x32xf32>
    %19 = vector.broadcast %1 : vector<1x32xf32> to vector<2x32xf32>
    %20 = arith.mulf %18, %19 : vector<2x32xf32>
    %21 = vector.broadcast %2 : vector<1x32xf32> to vector<2x32xf32>
    %22 = arith.addf %20, %21 : vector<2x32xf32>
    %c0_9 = arith.constant 0 : index
    %c0_10 = arith.constant 0 : index
    %23 = vector.load %arg3[%c0_9, %c0_10] : memref<1x32xf32, #tpu.memory_space<vmem>>, vector<1x32xf32>
    %24 = vector.broadcast %23 : vector<1x32xf32> to vector<2x32xf32>
    %25 = arith.mulf %22, %24 : vector<2x32xf32>
    %cst_11 = arith.constant dense<0.000000e+00> : vector<2xf32>
    %26 = vector.multi_reduction <add>, %25, %cst_11 [1] : vector<2x32xf32> to vector<2xf32>
    %27 = vector.shape_cast %26 : vector<2xf32> to vector<2x1xf32>
    %c0_12 = arith.constant 0 : index
    %c0_13 = arith.constant 0 : index
    %28 = vector.load %arg4[%c0_12, %c0_13] : memref<1x1xf32, #tpu.memory_space<vmem>>, vector<1x1xf32>
    %29 = vector.broadcast %28 : vector<1x1xf32> to vector<2x1xf32>
    %30 = arith.addf %27, %29 : vector<2x1xf32>
    %c0_14 = arith.constant 0 : index
    %c0_15 = arith.constant 0 : index
    %31 = vector.load %arg5[%c0_14, %c0_15] : memref<2x1xf32, #tpu.memory_space<vmem>>, vector<2x1xf32>
    tpu.vector_store %arg5[%c0_14, %c0_15], %30 {strides = array<i32>} : memref<2x1xf32, #tpu.memory_space<vmem>>, vector<2x1xf32>,
    return
  }
}

module attributes {stable_mosaic.version = 11 : i64} {
  func.func @_block_kernel(%arg0: i32, %arg1: memref<1x8x32xf32, #tpu.memory_space<vmem>>, %arg2: memref<1x32xf32, #tpu.memory_space<vmem>>, %arg3: memref<1x32xf32, #tpu.memory_space<vmem>>, %arg4: memref<32x96xf32, #tpu.memory_space<vmem>>, %arg5: memref<32x32xf32, #tpu.memory_space<vmem>>, %arg6: memref<1x32xf32, #tpu.memory_space<vmem>>, %arg7: memref<1x32xf32, #tpu.memory_space<vmem>>, %arg8: memref<1x32xf32, #tpu.memory_space<vmem>>, %arg9: memref<32x128xf32, #tpu.memory_space<vmem>>, %arg10: memref<1x128xf32, #tpu.memory_space<vmem>>, %arg11: memref<128x32xf32, #tpu.memory_space<vmem>>, %arg12: memref<1x32xf32, #tpu.memory_space<vmem>>, %arg13: memref<1x8x32xf32, #tpu.memory_space<vmem>>) attributes {dimension_semantics = [#tpu.dimension_semantics<parallel>], iteration_bounds = array<i64: 2>, scalar_prefetch = 0 : i64, scratch_operands = 0 : i64, tpu.core_type = #tpu.core_type<tc>, window_params = [{transform_indices = @transform_0, window_bounds = array<i64: 1, 8, 32>}, {pipeline_mode = #tpu.pipeline_mode<synchronous>, transform_indices = @transform_1, window_bounds = array<i64: 1, 32>}, {pipeline_mode = #tpu.pipeline_mode<synchronous>, transform_indices = @transform_2, window_bounds = array<i64: 1, 32>}, {pipeline_mode = #tpu.pipeline_mode<synchronous>, transform_indices = @transform_3, window_bounds = array<i64: 32, 96>}, {pipeline_mode = #tpu.pipeline_mode<synchronous>, transform_indices = @transform_4, window_bounds = array<i64: 32, 32>}, {pipeline_mode = #tpu.pipeline_mode<synchronous>, transform_indices = @transform_5, window_bounds = array<i64: 1, 32>}, {pipeline_mode = #tpu.pipeline_mode<synchronous>, transform_indices = @transform_6, window_bounds = array<i64: 1, 32>}, {pipeline_mode = #tpu.pipeline_mode<synchronous>, transform_indices = @transform_7, window_bounds = array<i64: 1, 32>}, {pipeline_mode = #tpu.pipeline_mode<synchronous>, transform_indices = @transform_8, window_bounds = array<i64: 32, 128>}, {pipeline_mode = #tpu.pipeline_mode<synchronous>, transform_indices = @transform_9, window_bounds = array<i64: 1, 128>}, {pipeline_mode = #tpu.pipeline_mode<synchronous>, transform_indices = @transform_10, window_bounds = array<i64: 128, 32>}, {pipeline_mode = #tpu.pipeline_mode<synchronous>, transform_indices = @transform_11, window_bounds = array<i64: 1, 32>}, {transform_indices = @transform_12, window_bounds = array<i64: 1, 8, 32>}]} {
    %c0 = arith.constant 0 : index
    %c0_0 = arith.constant 0 : index
    %c0_1 = arith.constant 0 : index
    %0 = vector.load %arg1[%c0, %c0_0, %c0_1] : memref<1x8x32xf32, #tpu.memory_space<vmem>>, vector<1x8x32xf32>
    %1 = vector.shape_cast %0 : vector<1x8x32xf32> to vector<8x32xf32>
    %c0_2 = arith.constant 0 : index
    %c0_3 = arith.constant 0 : index
    %2 = vector.load %arg2[%c0_2, %c0_3] : memref<1x32xf32, #tpu.memory_space<vmem>>, vector<1x32xf32>
    %c0_4 = arith.constant 0 : index
    %c0_5 = arith.constant 0 : index
    %3 = vector.load %arg3[%c0_4, %c0_5] : memref<1x32xf32, #tpu.memory_space<vmem>>, vector<1x32xf32>
    %cst = arith.constant dense<0.000000e+00> : vector<8xf32>
    %4 = vector.multi_reduction <add>, %1, %cst [1] : vector<8x32xf32> to vector<8xf32>
    %5 = vector.shape_cast %4 : vector<8xf32> to vector<8x1xf32>
    %cst_6 = arith.constant 3.200000e+01 : f32
    %6 = vector.broadcast %cst_6 : f32 to vector<8x1xf32>
    %7 = arith.divf %5, %6 : vector<8x1xf32>
    %8 = vector.broadcast %7 : vector<8x1xf32> to vector<8x32xf32>
    %9 = arith.subf %1, %8 : vector<8x32xf32>
    %10 = arith.mulf %9, %9 : vector<8x32xf32>
    %cst_7 = arith.constant dense<0.000000e+00> : vector<8xf32>
    %11 = vector.multi_reduction <add>, %10, %cst_7 [1] : vector<8x32xf32> to vector<8xf32>
    %12 = vector.shape_cast %11 : vector<8xf32> to vector<8x1xf32>
    %cst_8 = arith.constant 3.200000e+01 : f32
    %13 = vector.broadcast %cst_8 : f32 to vector<8x1xf32>
    %14 = arith.divf %12, %13 : vector<8x1xf32>
    %cst_9 = arith.constant 9.99999974E-6 : f32
    %15 = vector.broadcast %cst_9 : f32 to vector<8x1xf32>
    %16 = arith.addf %14, %15 : vector<8x1xf32>
    %17 = math.rsqrt %16 : vector<8x1xf32>
    %18 = vector.broadcast %17 : vector<8x1xf32> to vector<8x32xf32>
    %19 = arith.mulf %9, %18 : vector<8x32xf32>
    %20 = vector.broadcast %2 : vector<1x32xf32> to vector<8x32xf32>
    %21 = arith.mulf %19, %20 : vector<8x32xf32>
    %22 = vector.broadcast %3 : vector<1x32xf32> to vector<8x32xf32>
    %23 = arith.addf %21, %22 : vector<8x32xf32>
    %c0_10 = arith.constant 0 : index
    %c0_11 = arith.constant 0 : index
    %24 = vector.load %arg4[%c0_10, %c0_11] : memref<32x96xf32, #tpu.memory_space<vmem>>, vector<32x96xf32>
    %cst_12 = arith.constant dense<0.000000e+00> : vector<8x96xf32>
    %25 = tpu.matmul %23, %24, %cst_12 {dimension_numbers = #tpu.dot_dimension_numbers<[1], [0], [0], [1], [0, 0, 1, 1], [], []>} : vector<8x32xf32>, vector<32x96xf32>, vector<8x96xf32> -> vector<8x96xf32>
    %26 = tpu.iota {dimensions = array<i32: 0>} : vector<8x8xi32>
    %27 = tpu.iota {dimensions = array<i32: 1>} : vector<8x8xi32>
    %28 = arith.cmpi sge, %26, %27 : vector<8x8xi32>
    %29 = vector.shape_cast %28 : vector<8x8xi1> to vector<1x8x8xi1>
    %30 = vector.extract_strided_slice %25 {offsets = [0, 0], sizes = [8, 8], strides = [1, 1]} : vector<8x96xf32> to vector<8x8xf32>
    %31 = vector.extract_strided_slice %25 {offsets = [0, 8], sizes = [8, 8], strides = [1, 1]} : vector<8x96xf32> to vector<8x8xf32>
    %32 = vector.extract_strided_slice %25 {offsets = [0, 16], sizes = [8, 8], strides = [1, 1]} : vector<8x96xf32> to vector<8x8xf32>
    %33 = vector.extract_strided_slice %25 {offsets = [0, 24], sizes = [8, 8], strides = [1, 1]} : vector<8x96xf32> to vector<8x8xf32>
    %34 = vector.shape_cast %30 : vector<8x8xf32> to vector<1x8x8xf32>
    %35 = vector.shape_cast %31 : vector<8x8xf32> to vector<1x8x8xf32>
    %36 = vector.shape_cast %32 : vector<8x8xf32> to vector<1x8x8xf32>
    %37 = vector.shape_cast %33 : vector<8x8xf32> to vector<1x8x8xf32>
    %38 = tpu.concatenate %34, %35, %36, %37 in 0 : vector<1x8x8xf32>, vector<1x8x8xf32>, vector<1x8x8xf32>, vector<1x8x8xf32> -> vector<4x8x8xf32>
    %39 = vector.extract_strided_slice %25 {offsets = [0, 32], sizes = [8, 8], strides = [1, 1]} : vector<8x96xf32> to vector<8x8xf32>
    %40 = vector.extract_strided_slice %25 {offsets = [0, 40], sizes = [8, 8], strides = [1, 1]} : vector<8x96xf32> to vector<8x8xf32>
    %41 = vector.extract_strided_slice %25 {offsets = [0, 48], sizes = [8, 8], strides = [1, 1]} : vector<8x96xf32> to vector<8x8xf32>
    %42 = vector.extract_strided_slice %25 {offsets = [0, 56], sizes = [8, 8], strides = [1, 1]} : vector<8x96xf32> to vector<8x8xf32>
    %43 = vector.shape_cast %39 : vector<8x8xf32> to vector<1x8x8xf32>
    %44 = vector.shape_cast %40 : vector<8x8xf32> to vector<1x8x8xf32>
    %45 = vector.shape_cast %41 : vector<8x8xf32> to vector<1x8x8xf32>
    %46 = vector.shape_cast %42 : vector<8x8xf32> to vector<1x8x8xf32>
    %47 = tpu.concatenate %43, %44, %45, %46 in 0 : vector<1x8x8xf32>, vector<1x8x8xf32>, vector<1x8x8xf32>, vector<1x8x8xf32> -> vector<4x8x8xf32>
    %48 = vector.extract_strided_slice %25 {offsets = [0, 64], sizes = [8, 8], strides = [1, 1]} : vector<8x96xf32> to vector<8x8xf32>
    %49 = vector.extract_strided_slice %25 {offsets = [0, 72], sizes = [8, 8], strides = [1, 1]} : vector<8x96xf32> to vector<8x8xf32>
    %50 = vector.extract_strided_slice %25 {offsets = [0, 80], sizes = [8, 8], strides = [1, 1]} : vector<8x96xf32> to vector<8x8xf32>
    %51 = vector.extract_strided_slice %25 {offsets = [0, 88], sizes = [8, 8], strides = [1, 1]} : vector<8x96xf32> to vector<8x8xf32>
    %52 = vector.shape_cast %48 : vector<8x8xf32> to vector<1x8x8xf32>
    %53 = vector.shape_cast %49 : vector<8x8xf32> to vector<1x8x8xf32>
    %54 = vector.shape_cast %50 : vector<8x8xf32> to vector<1x8x8xf32>
    %55 = vector.shape_cast %51 : vector<8x8xf32> to vector<1x8x8xf32>
    %56 = tpu.concatenate %52, %53, %54, %55 in 0 : vector<1x8x8xf32>, vector<1x8x8xf32>, vector<1x8x8xf32>, vector<1x8x8xf32> -> vector<4x8x8xf32>
    "tpu.trace_start"() <{level = 10 : i32, message = "hqd,hkd->hqk"}> : () -> ()
    %cst_13 = arith.constant dense<0.000000e+00> : vector<4x8x8xf32>
    %57 = tpu.matmul %38, %47, %cst_13 {dimension_numbers = #tpu.dot_dimension_numbers<[2], [2], [1], [1], [0, 0, 0, 1, 1, 1], [0], [0]>} : vector<4x8x8xf32>, vector<4x8x8xf32>, vector<4x8x8xf32> -> vector<4x8x8xf32>
    %cst_14 = arith.constant 0xFF800000 : f32
    "tpu.trace_stop"() : () -> ()
    %58 = vector.shape_cast %29 : vector<1x8x8xi1> to vector<1x8x8xi1>
    %59 = vector.broadcast %58 : vector<1x8x8xi1> to vector<4x8x8xi1>
    %60 = vector.broadcast %cst_14 : f32 to vector<4x8x8xf32>
    %61 = arith.select %59, %57, %60 : vector<4x8x8xi1>, vector<4x8x8xf32>
    %cst_15 = arith.constant dense<0xFF800000> : vector<4x8xf32>
    %62 = vector.multi_reduction <maximumf>, %61, %cst_15 [2] : vector<4x8x8xf32> to vector<4x8xf32>
    %63 = vector.shape_cast %62 : vector<4x8xf32> to vector<4x8x1xf32>
    %64 = vector.broadcast %63 : vector<4x8x1xf32> to vector<4x8x8xf32>
    %65 = arith.subf %61, %64 : vector<4x8x8xf32>
    %66 = math.exp %65 : vector<4x8x8xf32>
    %cst_16 = arith.constant dense<0.000000e+00> : vector<4x8xf32>
    %67 = vector.multi_reduction <add>, %66, %cst_16 [2] : vector<4x8x8xf32> to vector<4x8xf32>
    %68 = vector.shape_cast %67 : vector<4x8xf32> to vector<4x8x1xf32>
    %69 = tpu.reciprocal %68 {approx = true} : vector<4x8x1xf32> -> vector<4x8x1xf32>
    %70 = vector.broadcast %69 : vector<4x8x1xf32> to vector<4x8x8xf32>
    %71 = arith.mulf %66, %70 : vector<4x8x8xf32>
    "tpu.trace_start"() <{level = 10 : i32, message = "hqk,hkd->hqd"}> : () -> ()
    %cst_17 = arith.constant dense<0.000000e+00> : vector<4x8x8xf32>
    %72 = tpu.matmul %71, %56, %cst_17 {dimension_numbers = #tpu.dot_dimension_numbers<[2], [1], [1], [2], [0, 0, 0, 1, 1, 2], [0], [0]>} : vector<4x8x8xf32>, vector<4x8x8xf32>, vector<4x8x8xf32> -> vector<4x8x8xf32>
    "tpu.trace_stop"() : () -> ()
    %73 = vector.extract_strided_slice %72 {offsets = [0, 0, 0], sizes = [1, 8, 8], strides = [1, 1, 1]} : vector<4x8x8xf32> to vector<1x8x8xf32>
    %74 = vector.shape_cast %73 : vector<1x8x8xf32> to vector<8x8xf32>
    %75 = vector.extract_strided_slice %72 {offsets = [1, 0, 0], sizes = [1, 8, 8], strides = [1, 1, 1]} : vector<4x8x8xf32> to vector<1x8x8xf32>
    %76 = vector.shape_cast %75 : vector<1x8x8xf32> to vector<8x8xf32>
    %77 = vector.extract_strided_slice %72 {offsets = [2, 0, 0], sizes = [1, 8, 8], strides = [1, 1, 1]} : vector<4x8x8xf32> to vector<1x8x8xf32>
    %78 = vector.shape_cast %77 : vector<1x8x8xf32> to vector<8x8xf32>
    %79 = vector.extract_strided_slice %72 {offsets = [3, 0, 0], sizes = [1, 8, 8], strides = [1, 1, 1]} : vector<4x8x8xf32> to vector<1x8x8xf32>
    %80 = vector.shape_cast %79 : vector<1x8x8xf32> to vector<8x8xf32>
    %81 = tpu.concatenate %74, %76, %78, %80 in 1 : vector<8x8xf32>, vector<8x8xf32>, vector<8x8xf32>, vector<8x8xf32> -> vector<8x32xf32>
    %c0_18 = arith.constant 0 : index
    %c0_19 = arith.constant 0 : index
    %82 = vector.load %arg5[%c0_18, %c0_19] : memref<32x32xf32, #tpu.memory_space<vmem>>, vector<32x32xf32>
    %cst_20 = arith.constant dense<0.000000e+00> : vector<8x32xf32>
    %83 = tpu.matmul %81, %82, %cst_20 {dimension_numbers = #tpu.dot_dimension_numbers<[1], [0], [0], [1], [0, 0, 1, 1], [], []>} : vector<8x32xf32>, vector<32x32xf32>, vector<8x32xf32> -> vector<8x32xf32>
    %84 = arith.addf %1, %83 : vector<8x32xf32>
    %c0_21 = arith.constant 0 : index
    %c0_22 = arith.constant 0 : index
    %85 = vector.load %arg6[%c0_21, %c0_22] : memref<1x32xf32, #tpu.memory_space<vmem>>, vector<1x32xf32>
    %86 = vector.broadcast %85 : vector<1x32xf32> to vector<8x32xf32>
    %87 = arith.addf %84, %86 : vector<8x32xf32>
    %c0_23 = arith.constant 0 : index
    %c0_24 = arith.constant 0 : index
    %88 = vector.load %arg7[%c0_23, %c0_24] : memref<1x32xf32, #tpu.memory_space<vmem>>, vector<1x32xf32>
    %c0_25 = arith.constant 0 : index
    %c0_26 = arith.constant 0 : index
    %89 = vector.load %arg8[%c0_25, %c0_26] : memref<1x32xf32, #tpu.memory_space<vmem>>, vector<1x32xf32>
    %cst_27 = arith.constant dense<0.000000e+00> : vector<8xf32>
    %90 = vector.multi_reduction <add>, %87, %cst_27 [1] : vector<8x32xf32> to vector<8xf32>
    %91 = vector.shape_cast %90 : vector<8xf32> to vector<8x1xf32>
    %cst_28 = arith.constant 3.200000e+01 : f32
    %92 = vector.broadcast %cst_28 : f32 to vector<8x1xf32>
    %93 = arith.divf %91, %92 : vector<8x1xf32>
    %94 = vector.broadcast %93 : vector<8x1xf32> to vector<8x32xf32>
    %95 = arith.subf %87, %94 : vector<8x32xf32>
    %96 = arith.mulf %95, %95 : vector<8x32xf32>
    %cst_29 = arith.constant dense<0.000000e+00> : vector<8xf32>
    %97 = vector.multi_reduction <add>, %96, %cst_29 [1] : vector<8x32xf32> to vector<8xf32>
    %98 = vector.shape_cast %97 : vector<8xf32> to vector<8x1xf32>
    %cst_30 = arith.constant 3.200000e+01 : f32
    %99 = vector.broadcast %cst_30 : f32 to vector<8x1xf32>
    %100 = arith.divf %98, %99 : vector<8x1xf32>
    %cst_31 = arith.constant 9.99999974E-6 : f32
    %101 = vector.broadcast %cst_31 : f32 to vector<8x1xf32>
    %102 = arith.addf %100, %101 : vector<8x1xf32>
    %103 = math.rsqrt %102 : vector<8x1xf32>
    %104 = vector.broadcast %103 : vector<8x1xf32> to vector<8x32xf32>
    %105 = arith.mulf %95, %104 : vector<8x32xf32>
    %106 = vector.broadcast %88 : vector<1x32xf32> to vector<8x32xf32>
    %107 = arith.mulf %105, %106 : vector<8x32xf32>
    %108 = vector.broadcast %89 : vector<1x32xf32> to vector<8x32xf32>
    %109 = arith.addf %107, %108 : vector<8x32xf32>
    %c0_32 = arith.constant 0 : index
    %c0_33 = arith.constant 0 : index
    %110 = vector.load %arg9[%c0_32, %c0_33] : memref<32x128xf32, #tpu.memory_space<vmem>>, vector<32x128xf32>
    %cst_34 = arith.constant dense<0.000000e+00> : vector<8x128xf32>
    %111 = tpu.matmul %109, %110, %cst_34 {dimension_numbers = #tpu.dot_dimension_numbers<[1], [0], [0], [1], [0, 0, 1, 1], [], []>} : vector<8x32xf32>, vector<32x128xf32>, vector<8x128xf32> -> vector<8x128xf32>
    %c0_35 = arith.constant 0 : index
    %c0_36 = arith.constant 0 : index
    %112 = vector.load %arg10[%c0_35, %c0_36] : memref<1x128xf32, #tpu.memory_space<vmem>>, vector<1x128xf32>
    %113 = vector.broadcast %112 : vector<1x128xf32> to vector<8x128xf32>
    %114 = arith.addf %111, %113 : vector<8x128xf32>
    %cst_37 = arith.constant 5.000000e-01 : f32
    %115 = vector.broadcast %cst_37 : f32 to vector<8x128xf32>
    %116 = arith.mulf %115, %114 : vector<8x128xf32>
    %cst_38 = arith.constant 4.471500e-02 : f32
    %117 = vector.broadcast %cst_38 : f32 to vector<8x128xf32>
    %118 = arith.mulf %117, %114 : vector<8x128xf32>
    %119 = arith.mulf %118, %114 : vector<8x128xf32>
    %120 = arith.mulf %119, %114 : vector<8x128xf32>
    %121 = arith.addf %114, %120 : vector<8x128xf32>
    %cst_39 = arith.constant 0.797884583 : f32
    %122 = vector.broadcast %cst_39 : f32 to vector<8x128xf32>
    %123 = arith.mulf %122, %121 : vector<8x128xf32>
    %124 = math.tanh %123 : vector<8x128xf32>
    %cst_40 = arith.constant 1.000000e+00 : f32
    %125 = vector.broadcast %cst_40 : f32 to vector<8x128xf32>
    %126 = arith.addf %125, %124 : vector<8x128xf32>
    %127 = arith.mulf %116, %126 : vector<8x128xf32>
    %c0_41 = arith.constant 0 : index
    %c0_42 = arith.constant 0 : index
    %128 = vector.load %arg11[%c0_41, %c0_42] : memref<128x32xf32, #tpu.memory_space<vmem>>, vector<128x32xf32>
    %cst_43 = arith.constant dense<0.000000e+00> : vector<8x32xf32>
    %129 = tpu.matmul %127, %128, %cst_43 {dimension_numbers = #tpu.dot_dimension_numbers<[1], [0], [0], [1], [0, 0, 1, 1], [], []>} : vector<8x128xf32>, vector<128x32xf32>, vector<8x32xf32> -> vector<8x32xf32>
    %c0_44 = arith.constant 0 : index
    %c0_45 = arith.constant 0 : index
    %130 = vector.load %arg12[%c0_44, %c0_45] : memref<1x32xf32, #tpu.memory_space<vmem>>, vector<1x32xf32>
    %131 = vector.broadcast %130 : vector<1x32xf32> to vector<8x32xf32>
    %132 = arith.addf %129, %131 : vector<8x32xf32>
    %133 = arith.addf %87, %132 : vector<8x32xf32>
    %c0_46 = arith.constant 0 : index
    %c0_47 = arith.constant 0 : index
    %c0_48 = arith.constant 0 : index
    %134 = vector.load %arg13[%c0_46, %c0_47, %c0_48] : memref<1x8x32xf32, #tpu.memory_space<vmem>>, vector<1x8x32xf32>
    %135 = vector.shape_cast %134 : vector<1x8x32xf32> to vector<8x32xf32>
    %136 = vector.shape_cast %133 : vector<8x32xf32> to vector<1x8x32xf32>
    tpu.vector_store %arg13[%c0_46, %c0_47, %c0_48], %136 {strides = array<i32>} : memref<1x8x32xf32, #tpu.memory_space<vmem>>, vector<1x8x32xf32>,
    return
  }
  func.func @transform_0(%arg0: i32) -> (i32, i32, i32) {
    %c0_i32 = arith.constant 0 : i32
    %c0_i32_0 = arith.constant 0 : i32
    %c0_i32_1 = arith.constant 0 : i32
    return %arg0, %c0_i32, %c0_i32_0 : i32, i32, i32
  }
  func.func @transform_1(%arg0: i32) -> (i32, i32) {
    %c0_i32 = arith.constant 0 : i32
    %c0_i32_0 = arith.constant 0 : i32
    %c0_i32_1 = arith.constant 0 : i32
    return %c0_i32, %c0_i32_0 : i32, i32
  }
  func.func @transform_2(%arg0: i32) -> (i32, i32) {
    %c0_i32 = arith.constant 0 : i32
    %c0_i32_0 = arith.constant 0 : i32
    %c0_i32_1 = arith.constant 0 : i32
    return %c0_i32, %c0_i32_0 : i32, i32
  }
  func.func @transform_3(%arg0: i32) -> (i32, i32) {
    %c0_i32 = arith.constant 0 : i32
    %c0_i32_0 = arith.constant 0 : i32
    %c0_i32_1 = arith.constant 0 : i32
    return %c0_i32, %c0_i32_0 : i32, i32
  }
  func.func @transform_4(%arg0: i32) -> (i32, i32) {
    %c0_i32 = arith.constant 0 : i32
    %c0_i32_0 = arith.constant 0 : i32
    %c0_i32_1 = arith.constant 0 : i32
    return %c0_i32, %c0_i32_0 : i32, i32
  }
  func.func @transform_5(%arg0: i32) -> (i32, i32) {
    %c0_i32 = arith.constant 0 : i32
    %c0_i32_0 = arith.constant 0 : i32
    %c0_i32_1 = arith.constant 0 : i32
    return %c0_i32, %c0_i32_0 : i32, i32
  }
  func.func @transform_6(%arg0: i32) -> (i32, i32) {
    %c0_i32 = arith.constant 0 : i32
    %c0_i32_0 = arith.constant 0 : i32
    %c0_i32_1 = arith.constant 0 : i32
    return %c0_i32, %c0_i32_0 : i32, i32
  }
  func.func @transform_7(%arg0: i32) -> (i32, i32) {
    %c0_i32 = arith.constant 0 : i32
    %c0_i32_0 = arith.constant 0 : i32
    %c0_i32_1 = arith.constant 0 : i32
    return %c0_i32, %c0_i32_0 : i32, i32
  }
  func.func @transform_8(%arg0: i32) -> (i32, i32) {
    %c0_i32 = arith.constant 0 : i32
    %c0_i32_0 = arith.constant 0 : i32
    %c0_i32_1 = arith.constant 0 : i32
    return %c0_i32, %c0_i32_0 : i32, i32
  }
  func.func @transform_9(%arg0: i32) -> (i32, i32) {
    %c0_i32 = arith.constant 0 : i32
    %c0_i32_0 = arith.constant 0 : i32
    %c0_i32_1 = arith.constant 0 : i32
    return %c0_i32, %c0_i32_0 : i32, i32
  }
  func.func @transform_10(%arg0: i32) -> (i32, i32) {
    %c0_i32 = arith.constant 0 : i32
    %c0_i32_0 = arith.constant 0 : i32
    %c0_i32_1 = arith.constant 0 : i32
    return %c0_i32, %c0_i32_0 : i32, i32
  }
  func.func @transform_11(%arg0: i32) -> (i32, i32) {
    %c0_i32 = arith.constant 0 : i32
    %c0_i32_0 = arith.constant 0 : i32
    %c0_i32_1 = arith.constant 0 : i32
    return %c0_i32, %c0_i32_0 : i32, i32
  }
  func.func @transform_12(%arg0: i32) -> (i32, i32, i32) {
    %c0_i32 = arith.constant 0 : i32
    %c0_i32_0 = arith.constant 0 : i32
    %c0_i32_1 = arith.constant 0 : i32
    return %arg0, %c0_i32, %c0_i32_0 : i32, i32, i32
  }
}

</mosaic_0001>

<bundles_post_ra>
// kernel: gpt_reward_forward.5
= control target key start
LH: loop header
LB: loop body
LE: loop exit
PB: predicated region body
PF: predicated region fallthrough
CT: control target
= control target key end

     0   :  { %vm25_vm0 = vcmask 254976   ;;  %vm73_vm1 = vcmask 1024   ;;  %s136_s0 = inlined_call_operand.vmem [shape: f32[2,32], index: 0, kind: input, shape index: {}]   ;;  %s137_s4 = inlined_call_operand.<no memory space> [shape: f32[1,1], index: 4, kind: input, shape index: {}]   ;;  %s138_s1 = inlined_call_operand.vmem [shape: f32[1,32], index: 1, kind: input, shape index: {}]   ;;  %s139_s2 = inlined_call_operand.vmem [shape: f32[1,32], index: 2, kind: input, shape index: {}]   ;;  %s140_s3 = inlined_call_operand.vmem [shape: f32[1,32], index: 3, kind: input, shape index: {}]   ;;  %s141_s5 = inlined_call_operand.vmem [shape: f32[2,1], index: 5, kind: output, shape index: {}]  }
   0x1   :  { %v22_v0 = vld [vmem:[%s136_s0] sm:$0x3]  ;;  %v10_v7 = vstv %s137_s4 }
   0x2   :  { %v26_v1 = vsel %vm25_vm0, %v22_v0, 0.0  ;;  %11 = vst [vmem:[#allocation2] sm:$0x1] %v10_v7  ;;  %v79_v12 = vld [vmem:[%s138_s1] ss:$0 sm:$0xff] }
   0x3   :  { %27 = vadd.xlane.f32.xlu0 %v26_v1  ;;  %v80_v14 = vld [vmem:[%s139_s2] ss:$0 sm:$0xff] }
   0x4   :  { %v81_v16 = vld [vmem:[%s140_s3] ss:$0 sm:$0xff] }
   0x9   :  { %v82_v20 = vld [vmem:[#allocation2] ss:$0 sm:$0xff] }
  0x90   :  { %v28_v2 = vpop.xlane.xlu0 %27 }
  0x91   :  { %v30_v3 = vmul.f32 0.03125, %v28_v2 }
  0x93   :  { %v31_v4 = vsub.f32 %v22_v0, %v30_v3 }
  0x95   :  { %v32_v5 = vmul.f32 %v31_v4, %v31_v4 }
  0x97   :  { %v33_v6 = vsel %vm25_vm0, %v32_v5, 0.0 }
  0x98   :  { %34 = vadd.xlane.f32.xlu0 %v33_v6 }
 0x125   :  { %v35_v8 = vpop.xlane.xlu0 %34 }
 0x126   :  { %v36_v9 = vmul.f32 0.03125, %v35_v8 }
 0x128   :  { %v37_v10 = vadd.f32 1e-05, %v36_v9 }
 0x12a   :  { %83 = vrsqrt.f32 %v37_v10 }
 0x134   :  { %v84_v11 = vpop.eup %83 }
 0x135   :  { %v39_v13 = vmul.f32 %v84_v11, %v31_v4 }
 0x137   :  { %v46_v15 = vmul.f32 %v79_v12, %v39_v13 }
 0x139   :  { %v53_v17 = vadd.f32 %v80_v14, %v46_v15 }
 0x13b   :  { %v61_v18 = vmul.f32 %v81_v16, %v53_v17 }
 0x13d   :  { %v62_v19 = vsel %vm25_vm0, %v61_v18, 0.0 }
 0x13e   :  { %63 = vadd.xlane.f32.xlu1 %v62_v19 }
 0x1cb   :  { %v64_v21 = vpop.xlane.xlu1 %63 }
 0x1cc   :  { %v72_v22 = vadd.f32 %v82_v20, %v64_v21 }
 0x1ce   :  { %74 = vst.msk [vmem:[%s141_s5] sm:$0x3] %vm73_vm1, %v72_v22 }

// kernel: gpt_reward_forward.3
= control target key start
LH: loop header
LB: loop body
LE: loop exit
PB: predicated region body
PF: predicated region fallthrough
CT: control target
= control target key end

     0   :  { %s1916_s21 = smov 0   ;;  %s2153_s0 = inlined_call_operand.vmem [shape: f32[2,8,32], index: 0, kind: input, shape index: {}]   ;;  %s2154_s1 = inlined_call_operand.vmem [shape: f32[1,32], index: 1, kind: input, shape index: {}]   ;;  %s2155_s2 = inlined_call_operand.vmem [shape: f32[1,32], index: 2, kind: input, shape index: {}]   ;;  %s2156_s3 = inlined_call_operand.vmem [shape: f32[32,96], index: 3, kind: input, shape index: {}]   ;;  %s2157_s4 = inlined_call_operand.vmem [shape: f32[32,32], index: 4, kind: input, shape index: {}]   ;;  %s2158_s5 = inlined_call_operand.vmem [shape: f32[1,32], index: 5, kind: input, shape index: {}]   ;;  %s2159_s6 = inlined_call_operand.vmem [shape: f32[1,32], index: 6, kind: input, shape index: {}]   ;;  %s2160_s7 = inlined_call_operand.vmem [shape: f32[1,32], index: 7, kind: input, shape index: {}]   ;;  %s2161_s8 = inlined_call_operand.vmem [shape: f32[32,128], index: 8, kind: input, shape index: {}]   ;;  %s2162_s9 = inlined_call_operand.vmem [shape: f32[1,128], index: 9, kind: input, shape index: {}]   ;;  %s2163_s10 = inlined_call_operand.vmem [shape: f32[128,32], index: 10, kind: input, shape index: {}]   ;;  %s2164_s11 = inlined_call_operand.vmem [shape: f32[1,32], index: 11, kind: input, shape index: {}]   ;;  %s2165_s12 = inlined_call_operand.vmem [shape: f32[2,8,32], index: 12, kind: output, shape index: {}]  }
   0x1 LB: > { %s1562_s22 = sadd.s32 4294967295, %s1838_s21   ;;  %p1566_p0 = scmp.ge.s32.totalorder %s1838_s21, 1  ;;  %s1838_s21 = sphi %s1916_s21, %s22_s21  }
   0x2   : > { %p361_p1 = scmp.lt.s32.totalorder %s1838_s21, 3 }
   0x4   : > { %p362_p2 = pnand %p1566_p0, %p361_p1 }
   0x5   : > { %p401_p3 = scmp.lt.s32.totalorder (!%p362_p2), %s1562_s22, 1  ;;  %vm412_vm0 = vcmask (!%p362_p2), 261120   ;;  %v441_v7 = vld [vmem:[%s2156_s3] sm:$0xff] (!%p362_p2)  ;;  %v442_v8 = vld [vmem:[%s2156_s3 + $0x8] sm:$0xff] (!%p362_p2)  ;;  %v443_v9 = vld [vmem:[%s2156_s3 + $0x10] sm:$0xff] (!%p362_p2)  ;;  %v1840_v10 = vmov (!%p362_p2), 0.0|0.0   ;;  %v518_v33 = vlaneseq (!%p362_p2) }
   0x6   : > { %365 = sbr.rel (%p362_p2) target bundleno = 2623 (0xa3f), region = 68  ;;  %1749 = vmatprep.subr.bf16.mxu1 (!%p362_p2), %v1840_v10  ;;  %v1750_v11 = vpack.c.bf16 (!%p362_p2), %v442_v8, %v441_v7  ;;  %v444_v12 = vld [vmem:[%s2156_s3 + $0x18] sm:$0xff] (!%p362_p2)  ;;  %vm1841_vm1 = vmmov (!%p362_p2), 0   ;;  %v1842_v13 = vmov (!%p362_p2), 0.0   ;;  %v1569_v19 = vld [vmem:[%s2154_s1] ss:$0 sm:$0xff] (!%p362_p2) }
   0x7   : > { %1649 = vmatprep.mubr.msk.f32.mxu1 (!%p362_p2), %vm1841_vm1, %v1842_v13  ;;  %1662 = vmatprep.subr.mxu0 (!%p362_p2), %v1842_v13  ;;  %v1753_v14 = vpack.c.bf16 (!%p362_p2), %v444_v12, %v443_v9  ;;  %v1570_v21 = vld [vmem:[%s2155_s2] ss:$0 sm:$0xff] (!%p362_p2)  ;;  %s1843_s24 = smov (!%p362_p2), 104   ;;  %s1844_s25 = smov (!%p362_p2), 120   ;;  %vm532_vm2 = vcmask (!%p362_p2), 64512   ;;  %v519_v34 = vshrl.u32 (!%p362_p2), %v518_v33, 7 }
   0x8   : > { %1664 = vmatprep.mubr.msk.f32.mxu0 (!%p362_p2), %vm1841_vm1, %v1842_v13  ;;  %1751 = vmatpush3.bf16.msra.mxu1 (!%p362_p2), %v1750_v11  ;;  %s1846_s27 = smov (!%p362_p2), 96   ;;  %v521_v35 = vand.u32 (!%p362_p2), 127, %v518_v33  ;;  %s1847_s28 = smov (!%p362_p2), 64   ;;  %v1209_v33 = vld [vmem:[%s2157_s4 + $0x18] sm:$0xff] (!%p362_p2)  ;;  %vm1202_vm4 = vcmask (!%p362_p2), 130048   ;;  %vm1204_vm5 = vcmask (!%p362_p2), 195584  }
   0x9   : > { %1752 = vmatprep.subr.bf16.mxu1 (!%p362_p2), %v1840_v10  ;;  %s1848_s19 = smov (!%p362_p2), 8   ;;  %s1849_s20 = smov (!%p362_p2), 16  }
   0xa   : > { %vm522_vm3 = vcmp.ge.s32.totalorder (!%p362_p2), %v519_v34, %v521_v35 }
   0xc   : > { %1754 = vmatpush3.bf16.msra.mxu1 (!%p362_p2), %v1753_v14 }
   0xd   : > { %s2167_s22 = smov (!%p401_p3, %s1562_s22), 1  ;;  %1652 = vmatprep.subr.mxu1 %v1842_v13 }
   0xe   : > { %s1567_s23 = sshll.u32 %s2167_s22, 3 }
   0xf   : > { %s404_s26 = scalar_lea.vmem %s2153_s0, %s1567_s23  ;;  %s408_s14 = scalar_lea.vmem %s2165_s12, %s1567_s23 }
  0x10   : > { %v1932_v0 = vld [vmem:[%s404_s26] sm:$0xff]  ;;  %s1845_s26 = smov 112  }
  0x11   : > { %v413_v1 = vsel %vm412_vm0, %v1932_v0, 0.0 }
  0x12   : > { %414 = vadd.xlane.f32.xlu0 %v413_v1 }
  0x9f   : > { %v415_v2 = vpop.xlane.xlu0 %414 }
  0xa0   : > { %v417_v3 = vmul.f32 0.03125, %v415_v2 }
  0xa2   : > { %v418_v4 = vsub.f32 %v1932_v0, %v417_v3 }
  0xa4   : > { %v419_v5 = vmul.f32 %v418_v4, %v418_v4 }
  0xa6   : > { %v420_v6 = vsel %vm412_vm0, %v419_v5, 0.0 }
  0xa7   : > { %421 = vadd.xlane.f32.xlu0 %v420_v6 }
 0x134   : > { %v422_v15 = vpop.xlane.xlu0 %421 }
 0x135   : > { %v423_v16 = vmul.f32 0.03125, %v422_v15 }
 0x137   : > { %v424_v17 = vadd.f32 1e-05, %v423_v16 }
 0x139   : > { %1810 = vrsqrt.f32 %v424_v17 }
 0x143   : > { %v1811_v18 = vpop.eup %1810 }
 0x144   : > { %v426_v20 = vmul.f32 %v1811_v18, %v418_v4 }
 0x146   : > { %v433_v22 = vmul.f32 %v1569_v19, %v426_v20 }
 0x148   : > { %v440_v23 = vadd.f32 %v1570_v21, %v433_v22 }
 0x14a   : > { %1650 = vmatmul.mubr.msk.f32.vlgmr.msra.gmra.mrb[0].mxu1 %vm412_vm0, %v440_v23 }
 0x14b   : > { %1654 = vmatprep.mubr.msk.f32.mxu1 %vm1841_vm1, %v1842_v13 }
 0x21d   : > { %v514_v24 = vpop.f32.mrb[0].mxu1 }
 0x21e   : > { %528 = vrot.lane.b32.xlu0 %v514_v24, %s1843_s24  ;;  %524 = vrot.lane.b32.xlu1 %v514_v24, %s1844_s25  ;;  %v1651_v25 = vpop.f32.mrb[1].mxu1  ;;  %s1850_s24 = smov 24  }
 0x222   : > { %526 = vrot.lane.b32.xlu1 %v514_v24, %s1845_s26 }
 0x226   : > { %530 = vrot.lane.b32.xlu1 %v514_v24, %s1846_s27 }
 0x290   : > { %v1967_v26 = vpop.permute.xlu1 %524  ;;  %v1973_v28 = vpop.permute.xlu0 %528 }
 0x291   : > { %607 = vrot.lane.b32.xlu1 %v1967_v26, %s1846_s27 }
 0x294   : > { %v1970_v27 = vpop.permute.xlu1 %526 }
 0x295   : > { %683 = vrot.lane.b32.xlu1 %v1970_v27, %s1846_s27 }
 0x298   : > { %v531_v29 = vpop.permute.xlu1 %530 }
 0x299   : > { %759 = vrot.lane.b32.xlu1 %v1973_v28, %s1846_s27  ;;  %1653 = vmatpush3.xpose.msk.msra.mxu1 %vm532_vm2, %v531_v29  ;;  %v1206_v29 = vld [vmem:[%s2157_s4] sm:$0xff] }
 0x29a   : > { %1657 = vmatprep.subr.mxu1 %v1842_v13 }
 0x29c   : > { %1655 = vmatmul.mubr.msk.f32.vlgmr.msra.gmra.mrb[2].mxu1 %vm532_vm2, %v514_v24 }
 0x29d   : > { %1659 = vmatprep.mubr.msk.f32.mxu1 %vm1841_vm1, %v1842_v13 }
 0x303   : > { %v608_v30 = vpop.permute.xlu1 %607 }
 0x304   : > { %1658 = vmatpush3.xpose.msk.msra.mxu1 %vm532_vm2, %v608_v30  ;;  %v1207_v30 = vld [vmem:[%s2157_s4 + $0x8] sm:$0xff] }
 0x305   : > { %1667 = vmatprep.subr.mxu1 %v1842_v13 }
 0x307   : > { %1660 = vmatmul.mubr.msk.f32.vlgmr.msra.gmra.mrb[4].mxu1 %vm532_vm2, %v1967_v26  ;;  %v684_v31 = vpop.permute.xlu1 %683 }
 0x308   : > { %1663 = vmatpush3.xpose.msk.msra.mxu0 %vm532_vm2, %v684_v31  ;;  %1669 = vmatprep.mubr.msk.f32.mxu1 %vm1841_vm1, %v1842_v13  ;;  %v1756_v31 = vpack.c.bf16 %v1207_v30, %v1206_v29  ;;  %v1427_v29 = vld [vmem:[%s2163_s10 + $0x68] sm:$0xff] }
 0x309   : > { %1672 = vmatprep.subr.mxu0 %v1842_v13 }
 0x30b   : > { %1665 = vmatmul.mubr.msk.f32.vlgmr.msra.gmra.mrb[0].mxu0 %vm532_vm2, %v1970_v27  ;;  %v760_v32 = vpop.permute.xlu1 %759 }
 0x30c   : > { %1668 = vmatpush3.xpose.msk.msra.mxu1 %vm532_vm2, %v760_v32  ;;  %1674 = vmatprep.mubr.msk.f32.mxu0 %vm1841_vm1, %v1842_v13  ;;  %v1208_v32 = vld [vmem:[%s2157_s4 + $0x10] sm:$0xff] }
 0x30d   : > { %1677 = vmatprep.subr.mxu1 %v1842_v13  ;;  %v1759_v34 = vpack.c.bf16 %v1209_v33, %v1208_v32  ;;  %v1429_v32 = vld [vmem:[%s2163_s10 + $0x78] sm:$0xff] }
 0x30f   : > { %1670 = vmatmul.mubr.msk.f32.vlgmr.msra.gmra.mrb[6].mxu1 %vm532_vm2, %v1973_v28 }
 0x310   : > { %1679 = vmatprep.mubr.msk.f32.mxu1 %vm1841_vm1, %v1842_v13 }
 0x36f   : > { %v603_v36 = vpop.f32.mrb[2].mxu1 }
 0x370   : > { %v837_v37 = vsel %vm522_vm3, %v603_v36, -inf  ;;  %v1656_v38 = vpop.f32.mrb[3].mxu1 }
 0x371   : > { %v841_v39 = vsel %vm532_vm2, %v837_v37, -inf }
 0x372   : > { %842 = vmax.xlane.f32.xlu1 %v841_v39 }
 0x3da   : > { %v679_v40 = vpop.f32.mrb[4].mxu1 }
 0x3db   : > { %v838_v41 = vsel %vm522_vm3, %v679_v40, -inf  ;;  %v1661_v42 = vpop.f32.mrb[5].mxu1 }
 0x3dc   : > { %v844_v43 = vsel %vm532_vm2, %v838_v41, -inf }
 0x3dd   : > { %845 = vmax.xlane.f32.xlu0 %v844_v43 }
 0x3de   : > { %v755_v44 = vpop.f32.mrb[0].mxu0 }
 0x3df   : > { %v839_v45 = vsel %vm522_vm3, %v755_v44, -inf  ;;  %v1666_v46 = vpop.f32.mrb[1].mxu0 }
 0x3e0   : > { %v847_v47 = vsel %vm532_vm2, %v839_v45, -inf }
 0x3e1   : > { %848 = vmax.xlane.f32.xlu1 %v847_v47 }
 0x3e2   : > { %v831_v48 = vpop.f32.mrb[6].mxu1 }
 0x3e3   : > { %v840_v49 = vsel %vm522_vm3, %v831_v48, -inf  ;;  %v1671_v50 = vpop.f32.mrb[7].mxu1  ;;  %v1585_v48 = vld [vmem:[%s2158_s5] ss:$0 sm:$0xff] }
 0x3e4   : > { %v850_v51 = vsel %vm532_vm2, %v840_v49, -inf }
 0x3e5   : > { %851 = vmax.xlane.f32.xlu0 %v850_v51 }
 0x3f2   : > { %885 = vrot.lane.b32.xlu1 %v514_v24, %s1847_s28 }
 0x3ff   : > { %v843_v52 = vpop.xlane.xlu1 %842 }
 0x400   : > { %v853_v53 = vsub.f32 %v837_v37, %v843_v52 }
 0x402   : > { %v857_v54 = vmul.f32 1.442695, %v853_v53 }
 0x404   : > { %1812 = vpow2.f32 %v857_v54 }
 0x40e   : > { %v1813_v55 = vpop.eup %1812 }
 0x40f   : > { %v865_v56 = vsel %vm532_vm2, %v1813_v55, 0.0 }
 0x416   : > { %866 = vadd.xlane.f32.xlu1 %v865_v56 }
 0x46a   : > { %v846_v57 = vpop.xlane.xlu0 %845 }
 0x46b   : > { %v854_v58 = vsub.f32 %v838_v41, %v846_v57  ;;  %v1321_v57 = vld [vmem:[%s2161_s8] sm:$0xff] }
 0x46d   : > { %v859_v59 = vmul.f32 1.442695, %v854_v58 }
 0x46e   : > { %v849_v60 = vpop.xlane.xlu1 %848 }
 0x46f   : > { %1814 = vpow2.f32 %v859_v59  ;;  %v855_v61 = vsub.f32 %v839_v45, %v849_v60  ;;  %v1323_v59 = vld [vmem:[%s2161_s8 + $0x10] sm:$0xff]  ;;  %v1324_v60 = vld [vmem:[%s2161_s8 + $0x18] sm:$0xff] }
 0x471   : > { %v861_v62 = vmul.f32 1.442695, %v855_v61  ;;  %v1765_v61 = vpack.c.bf16 %v1324_v60, %v1323_v59 }
 0x472   : > { %v886_v63 = vpop.permute.xlu1 %885  ;;  %v852_v1 = vpop.xlane.xlu0 %851 }
 0x473   : > { %1816 = vpow2.f32 %v861_v62  ;;  %v856_v2 = vsub.f32 %v840_v49, %v852_v1  ;;  %1673 = vmatpush3.msra.mxu0 %v886_v63  ;;  %v1414_v62 = vld [vmem:[%s2163_s10] sm:$0xff]  ;;  %v1415_v63 = vld [vmem:[%s2163_s10 + $0x8] sm:$0xff] }
 0x474   : > { %1682 = vmatprep.subr.mxu0 %v1842_v13  ;;  %v1768_v1 = vpack.c.bf16 %v1415_v63, %v1414_v62 }
 0x475   : > { %v863_v3 = vmul.f32 1.442695, %v856_v2 }
 0x477   : > { %1818 = vpow2.f32 %v863_v3 }
 0x479   : > { %v1815_v4 = vpop.eup %1814 }
 0x47a   : > { %v868_v5 = vsel %vm532_vm2, %v1815_v4, 0.0 }
 0x47b   : > { %869 = vadd.xlane.f32.xlu0 %v868_v5 }
 0x47d   : > { %v1817_v6 = vpop.eup %1816 }
 0x47e   : > { %v871_v7 = vsel %vm532_vm2, %v1817_v6, 0.0 }
 0x47f   : > { %872 = vadd.xlane.f32.xlu1 %v871_v7 }
 0x481   : > { %v1819_v8 = vpop.eup %1818 }
 0x482   : > { %v874_v9 = vsel %vm532_vm2, %v1819_v8, 0.0 }
 0x483   : > { %875 = vadd.xlane.f32.xlu0 %v874_v9 }
 0x490   : > { %1037 = vrot.lane.b32.xlu1 %v1970_v27, %s1847_s28 }
 0x494   : > { %1113 = vrot.lane.b32.xlu1 %v1973_v28, %s1847_s28 }
 0x499   : > { %961 = vrot.lane.b32.xlu0 %v1967_v26, %s1847_s28 }
 0x4a3   : > { %v867_v11 = vpop.xlane.xlu1 %866 }
 0x4a4   : > { %1820 = vrcp.f32 %v867_v11 }
 0x4ae   : > { %v1821_v12 = vpop.eup %1820 }
 0x4af   : > { %v881_v14 = vmul.f32 %v1821_v12, %v1813_v55  ;;  %v1416_v12 = vld [vmem:[%s2163_s10 + $0x10] sm:$0xff] }
 0x4b1   : > { %1675 = vmatmul.mubr.msk.f32.vlgmr.msra.gmra.mrb[2].mxu0 %vm532_vm2, %v881_v14  ;;  %v1417_v14 = vld [vmem:[%s2163_s10 + $0x18] sm:$0xff] }
 0x4b2   : > { %1684 = vmatprep.mubr.msk.f32.mxu0 %vm1841_vm1, %v1842_v13 }
 0x508   : > { %v870_v15 = vpop.xlane.xlu0 %869 }
 0x509   : > { %1822 = vrcp.f32 %v870_v15  ;;  %v1771_v15 = vpack.c.bf16 %v1417_v14, %v1416_v12 }
 0x50c   : > { %v873_v16 = vpop.xlane.xlu1 %872 }
 0x50d   : > { %1824 = vrcp.f32 %v873_v16  ;;  %v1418_v16 = vld [vmem:[%s2163_s10 + $0x20] sm:$0xff] }
 0x510   : > { %v1038_v17 = vpop.permute.xlu1 %1037  ;;  %v876_v18 = vpop.xlane.xlu0 %875 }
 0x511   : > { %1826 = vrcp.f32 %v876_v18  ;;  %1683 = vmatpush3.msra.mxu0 %v1038_v17  ;;  %v1419_v17 = vld [vmem:[%s2163_s10 + $0x28] sm:$0xff] }
 0x512   : > { %1767 = vmatprep.subr.bf16.mxu0 %v1840_v10  ;;  %v1774_v18 = vpack.c.bf16 %v1419_v17, %v1418_v16 }
 0x513   : > { %v1823_v19 = vpop.eup %1822 }
 0x514   : > { %v882_v20 = vmul.f32 %v1823_v19, %v1815_v4  ;;  %v962_v21 = vpop.permute.xlu0 %961  ;;  %v1114_v22 = vpop.permute.xlu1 %1113  ;;  %v1420_v19 = vld [vmem:[%s2163_s10 + $0x30] sm:$0xff] }
 0x515   : > { %1678 = vmatpush3.msra.mxu1 %v962_v21 }
 0x516   : > { %1680 = vmatmul.mubr.msk.f32.vlgmr.msra.gmra.mrb[8].mxu1 %vm532_vm2, %v882_v20  ;;  %1687 = vmatprep.subr.mxu1 %v1842_v13  ;;  %v1421_v20 = vld [vmem:[%s2163_s10 + $0x38] sm:$0xff] }
 0x517   : > { %v1825_v23 = vpop.eup %1824  ;;  %1688 = vmatpush3.msra.mxu1 %v1114_v22  ;;  %1689 = vmatprep.mubr.msk.f32.mxu1 %vm1841_vm1, %v1842_v13  ;;  %v1777_v21 = vpack.c.bf16 %v1421_v20, %v1420_v19  ;;  %v1422_v22 = vld [vmem:[%s2163_s10 + $0x40] sm:$0xff] }
 0x518   : > { %v883_v24 = vmul.f32 %v1825_v23, %v1817_v6  ;;  %1755 = vmatprep.subr.bf16.mxu1 %v1840_v10  ;;  %v1586_v6 = vld [vmem:[%s2159_s6] ss:$0 sm:$0xff]  ;;  %v1423_v23 = vld [vmem:[%s2163_s10 + $0x48] sm:$0xff] }
 0x51a   : > { %1685 = vmatmul.mubr.msk.f32.vlgmr.msra.gmra.mrb[4].mxu0 %vm532_vm2, %v883_v24  ;;  %v1780_v24 = vpack.c.bf16 %v1423_v23, %v1422_v22 }
 0x51b   : > { %v1827_v25 = vpop.eup %1826  ;;  %1746 = vmatprep.mubr.msk.f32.mxu0 %vm1841_vm1, %v1842_v13  ;;  %1769 = vmatpush3.bf16.msra.mxu0 %v1768_v1 }
 0x51c   : > { %v884_v26 = vmul.f32 %v1827_v25, %v1819_v8  ;;  %1770 = vmatprep.subr.bf16.mxu0 %v1840_v10  ;;  %v1587_v8 = vld [vmem:[%s2160_s7] ss:$0 sm:$0xff]  ;;  %v1424_v25 = vld [vmem:[%s2163_s10 + $0x50] sm:$0xff] }
 0x51e   : > { %1690 = vmatmul.mubr.msk.f32.vlgmr.msra.gmra.mrb[10].mxu1 %vm532_vm2, %v884_v26  ;;  %v1425_v26 = vld [vmem:[%s2163_s10 + $0x58] sm:$0xff] }
 0x51f   : > { %1700 = vmatprep.mubr.msk.f32.mxu1 %vm1841_vm1, %v1842_v13  ;;  %1757 = vmatpush3.bf16.msra.mxu1 %v1756_v31  ;;  %v1428_v31 = vld [vmem:[%s2163_s10 + $0x70] sm:$0xff] }
 0x520   : > { %1758 = vmatprep.subr.bf16.mxu1 %v1840_v10  ;;  %1772 = vmatpush3.bf16.msra.mxu0 %v1771_v15  ;;  %v1789_v33 = vpack.c.bf16 %v1429_v32, %v1428_v31 }
 0x521   : > { %1773 = vmatprep.subr.bf16.mxu0 %v1840_v10 }
 0x523   : > { %1760 = vmatpush3.bf16.msra.mxu1 %v1759_v34  ;;  %v1588_v34 = vld [vmem:[%s2162_s9] ss:$0 sm:$0xff] }
 0x524   : > { %1761 = vmatprep.subr.bf16.mxu1 %v1840_v10  ;;  %1775 = vmatpush3.bf16.msra.mxu0 %v1774_v18 }
 0x525   : > { %1776 = vmatprep.subr.bf16.mxu0 %v1840_v10 }
 0x528   : > { %1778 = vmatpush3.bf16.msra.mxu0 %v1777_v21 }
 0x529   : > { %1779 = vmatprep.subr.bf16.mxu0 %v1840_v10 }
 0x52c   : > { %1781 = vmatpush3.bf16.msra.mxu0 %v1780_v24 }
 0x52d   : > { %1782 = vmatprep.subr.bf16.mxu0 %v1840_v10 }
 0x584   : > { %v957_v27 = vpop.f32.mrb[2].mxu0 }
 0x585   : > { %v1676_v28 = vpop.f32.mrb[3].mxu0 }
 0x586   : > { %v1426_v28 = vld [vmem:[%s2163_s10 + $0x60] sm:$0xff] }
 0x587   : > { %v1786_v30 = vpack.c.bf16 %v1427_v29, %v1426_v28 }
 0x5e9   : > { %v1033_v35 = vpop.f32.mrb[8].mxu1 }
 0x5ea   : > { %1190 = vrot.lane.b32.xlu0 %v1033_v35, %s1848_s19  ;;  %v1681_v36 = vpop.f32.mrb[9].mxu1 }
 0x5ed   : > { %v1109_v37 = vpop.f32.mrb[4].mxu0 }
 0x5ee   : > { %1194 = vrot.lane.b32.xlu1 %v1109_v37, %s1849_s20  ;;  %v1686_v38 = vpop.f32.mrb[5].mxu0 }
 0x5f1   : > { %v1185_v39 = vpop.f32.mrb[10].mxu1 }
 0x5f2   : > { %1198 = vrot.lane.b32.xlu0 %v1185_v39, %s1850_s24  ;;  %v1691_v40 = vpop.f32.mrb[11].mxu1 }
 0x65c   : > { %v1191_v41 = vpop.permute.xlu0 %1190 }
 0x65d   : > { %v1201_v43 = vsel %vm532_vm2, %v957_v27, %v1191_v41  ;;  %v1783_v27 = vpack.c.bf16 %v1425_v26, %v1424_v25 }
 0x65f   : > { %1784 = vmatpush3.bf16.msra.mxu0 %v1783_v27 }
 0x660   : > { %v1195_v42 = vpop.permute.xlu1 %1194  ;;  %1785 = vmatprep.subr.bf16.mxu0 %v1840_v10 }
 0x661   : > { %v1203_v44 = vsel %vm1202_vm4, %v1201_v43, %v1195_v42 }
 0x663   : > { %1787 = vmatpush3.bf16.msra.mxu0 %v1786_v30 }
 0x664   : > { %v1199_v45 = vpop.permute.xlu0 %1198  ;;  %1788 = vmatprep.subr.bf16.mxu0 %v1840_v10 }
 0x665   : > { %v1205_v46 = vsel %vm1204_vm5, %v1203_v44, %v1199_v45 }
 0x666   : > { %1701 = vmatmul.mubr.msk.f32.vlgmr.msra.gmra.mrb[12].mxu1 %vm412_vm0, %v1205_v46 }
 0x667   : > { %1711 = vmatprep.mubr.msk.f32.mxu1 %vm1841_vm1, %v1842_v13  ;;  %1790 = vmatpush3.bf16.msra.mxu0 %v1789_v33 }
 0x739   : > { %v1279_v47 = vpop.f32.mrb[12].mxu1 }
 0x73a   : > { %v1283_v49 = vadd.f32 %v1279_v47, %v1932_v0  ;;  %v1702_v50 = vpop.f32.mrb[13].mxu1  ;;  %v1322_v0 = vld [vmem:[%s2161_s8 + $0x8] sm:$0xff] }
 0x73b   : > { %v1762_v58 = vpack.c.bf16 %v1322_v0, %v1321_v57 }
 0x73c   : > { %v2056_v51 = vadd.f32 %v1585_v48, %v1283_v49 }
 0x73d   : > { %1763 = vmatpush3.bf16.msra.mxu1 %v1762_v58 }
 0x73e   : > { %v1294_v52 = vsel %vm412_vm0, %v2056_v51, 0.0  ;;  %1764 = vmatprep.subr.bf16.mxu1 %v1840_v10  ;;  %v1590_v10 = vld [vmem:[%s2164_s11] ss:$0 sm:$0xff] }
 0x73f   : > { %1295 = vadd.xlane.f32.xlu1 %v1294_v52 }
 0x741   : > { %1766 = vmatpush3.bf16.msra.mxu1 %v1765_v61 }
 0x7cc   : > { %v1296_v53 = vpop.xlane.xlu1 %1295 }
 0x7cd   : > { %v1297_v54 = vmul.f32 0.03125, %v1296_v53 }
 0x7cf   : > { %v1298_v55 = vsub.f32 %v2056_v51, %v1297_v54 }
 0x7d1   : > { %v1299_v56 = vmul.f32 %v1298_v55, %v1298_v55 }
 0x7d3   : > { %v1300_v13 = vsel %vm412_vm0, %v1299_v56, 0.0 }
 0x7d4   : > { %1301 = vadd.xlane.f32.xlu0 %v1300_v13 }
 0x861   : > { %v1302_v2 = vpop.xlane.xlu0 %1301 }
 0x862   : > { %v1303_v3 = vmul.f32 0.03125, %v1302_v2 }
 0x864   : > { %v1304_v4 = vadd.f32 1e-05, %v1303_v3 }
 0x866   : > { %1828 = vrsqrt.f32 %v1304_v4 }
 0x870   : > { %v1829_v5 = vpop.eup %1828 }
 0x871   : > { %v1306_v7 = vmul.f32 %v1829_v5, %v1298_v55 }
 0x873   : > { %v1313_v9 = vmul.f32 %v1586_v6, %v1306_v7 }
 0x875   : > { %v1320_v11 = vadd.f32 %v1587_v8, %v1313_v9 }
 0x877   : > { %1712 = vmatmul.mubr.msk.f32.vlgmr.msra.gmra.mrb[14].mxu1 %vm412_vm0, %v1320_v11 }
 0x94a   : > { %v1401_v35 = vpop.f32.mrb[14].mxu1 }
 0x94b   : > { %v1402_v36 = vadd.f32 %v1588_v34, %v1401_v35  ;;  %v1713_v37 = vpop.f32.mrb[15].mxu1 }
 0x94d   : > { %v1406_v38 = vmul.f32 0.044715, %v1402_v36  ;;  %v1405_v44 = vmul.f32 0.5, %v1402_v36 }
 0x94f   : > { %v1407_v39 = vmul.f32 %v1406_v38, %v1402_v36 }
 0x951   : > { %v1408_v40 = vmul.f32 %v1407_v39, %v1402_v36 }
 0x953   : > { %v1409_v41 = vadd.f32 %v1408_v40, %v1402_v36 }
 0x955   : > { %v1410_v42 = vmul.f32 0.7978846, %v1409_v41 }
 0x957   : > { %1830 = vtanh.f32 %v1410_v42 }
 0x961   : > { %v1831_v43 = vpop.eup %1830 }
 0x962   : > { %v1412_v45 = vadd.f32 1.0, %v1831_v43 }
 0x964   : > { %v1413_v46 = vmul.f32 %v1412_v45, %v1405_v44 }
 0x966   : > { %1747 = vmatmul.mubr.f32.vlgmr.msra.gmra.mrb[6].mxu0 %v1413_v46 }
 0xa39   : > { %v1503_v47 = vpop.f32.mrb[6].mxu0 }
 0xa3a   : > { %v1504_v48 = vadd.f32 %v1590_v10, %v1503_v47  ;;  %v1748_v49 = vpop.f32.mrb[7].mxu0 }
 0xa3c   : > { %v1507_v50 = vadd.f32 %v1504_v48, %v2056_v51 }
 0xa3e   : > { %1508 = vst.msk [vmem:[%s408_s14] sm:$0xff] %vm412_vm0, %v1507_v50 }
 0xa3f PF: > { %s22_s21 = sadd.s32 1, %s1838_s21  }
 0xa40   : > { %p19_p4 = scmp.ge.s32.totalorder %s22_s21, 4  }
 0xa42   :  { %21 = sbr.rel (!%p19_p4) target bundleno = 1 (0x1), region = 98 }

</bundles_post_ra>
